<compile_context>
chip_gen: v5e
topology: v5e:2x2
jax: 0.10.0
libtpu: 0.0.40
codegen_flags: <defaults>
</compile_context>

<pallas_src>
import functools
import math

import numpy as np
import jax
import jax.numpy as jnp
from jax import lax
from jax.experimental import pallas as pl
from jax.experimental.pallas import tpu as pltpu

_LN_EPS = 1e-5  # torch.nn.LayerNorm default


def _round_up(v, m):
    return (v + m - 1) // m * m


def _erf_approx(v):
    # Abramowitz & Stegun 7.1.26 (max abs error ~1.5e-7); built only from ops
    # with guaranteed Mosaic lowerings (exp / mul / add / where / abs).
    a1, a2, a3, a4, a5 = (0.254829592, -0.284496736, 1.421413741,
                          -1.453152027, 1.061405429)
    p = 0.3275911
    a = jnp.abs(v)
    t = 1.0 / (1.0 + p * a)
    poly = ((((a5 * t + a4) * t + a3) * t + a2) * t + a1) * t
    y = 1.0 - poly * jnp.exp(-a * a)
    return jnp.where(v >= 0.0, y, -y)


def _gelu_erf(v):
    # nn.GELU() default (exact erf form).  Kept in f32 for accuracy and v5e
    # portability (no bf16 VALU there); exp lands on the EUP slot anyway.
    return 0.5 * v * (1.0 + _erf_approx(v * 0.7071067811865476))


def _block_math(x, ffwd, ginv, wre, wim, g1, b1, cmask, w1, bm1, w2, bm2,
                *, C, Mp):
    """Shared math for the kernel body and the precision-matched reference.

    x: (N, Cp) f32 with channels zero-padded to Cp lanes.  Matmul operands are
    bf16, all accumulation is f32 on the MXU; elementwise math is f32.
    """
    Cp = x.shape[-1]
    inv_c = 1.0 / C
    pad_lanes = (Cp != C)

    def ln_norm(v):
        # LayerNorm normalization over the real C channels only (affine is
        # applied by the caller or folded into the next matmul).
        mu = jnp.sum(v, axis=-1, keepdims=True) * inv_c
        vc = v - mu
        if pad_lanes:                 # static Python branch
            vc = vc * cmask           # zero out padded lanes before the var sum
        var = jnp.sum(vc * vc, axis=-1, keepdims=True) * inv_c
        return vc * lax.rsqrt(var + _LN_EPS)

    # ---- norm1 (g1/b1 are zero in padded lanes -> y padded lanes stay 0) ----
    y16 = (ln_norm(x) * g1 + b1).astype(jnp.bfloat16)

    # ---- GlobalFilter: stacked ortho rfft2 -> complex weight -> irfft2 ------
    zz = jnp.dot(ffwd, y16, preferred_element_type=jnp.float32)      # (2Mp, Cp)
    zre, zim = zz[:Mp], zz[Mp:]                                      # aligned
    wre32 = wre.astype(jnp.float32)
    wim32 = wim.astype(jnp.float32)
    pre = zre * wre32 - zim * wim32                                  # complex *
    pim = zre * wim32 + zim * wre32
    pp = jnp.concatenate([pre, pim], axis=0).astype(jnp.bfloat16)    # (2Mp, Cp)
    f = jnp.dot(ginv, pp, preferred_element_type=jnp.float32)        # (N, Cp)

    # ---- norm2 (affine folded into w1/bm1) + MLP (gamma folded into w2/bm2) -
    z16 = ln_norm(f).astype(jnp.bfloat16)
    h = jnp.dot(z16, w1, preferred_element_type=jnp.float32) + bm1   # (N, Hd)
    h16 = _gelu_erf(h).astype(jnp.bfloat16)
    o = jnp.dot(h16, w2, preferred_element_type=jnp.float32) + bm2   # (N, Cp)

    # ---- residual (f32) -----------------------------------------------------
    return x + o


def _block_kernel(C, Mp, x_ref, ffwd_ref, ginv_ref, wre_ref, wim_ref,
                  g1_ref, b1_ref, cmask_ref, w1_ref, bm1_ref, w2_ref, bm2_ref,
                  o_ref):
    o_ref[0] = _block_math(
        x_ref[0], ffwd_ref[...], ginv_ref[...], wre_ref[...], wim_ref[...],
        g1_ref[...], b1_ref[...], cmask_ref[...], w1_ref[...], bm1_ref[...],
        w2_ref[...], bm2_ref[...], C=C, Mp=Mp)


def _make_dft_matrices(H, W):
    """Real matrices implementing torch.fft.rfft2 / irfft2 with norm='ortho'.

    Validated numerically for even, square H == W (the module's use case:
    H = W = sqrt(N)).  The c2r transform only uses the real part of the DC /
    Nyquist columns, matching numpy/torch irfft semantics.
    """
    Wf = W // 2 + 1
    g = np.arange(H)[:, None, None, None]
    k = np.arange(Wf)[None, :, None, None]
    h = np.arange(H)[None, None, :, None]
    w = np.arange(W)[None, None, None, :]
    ang = 2.0 * np.pi * (g * h / H + k * w / W)              # (H, Wf, H, W)
    scale = 1.0 / math.sqrt(H * W)
    M, Nsp = H * Wf, H * W

    Fc = (np.cos(ang) * scale).reshape(M, Nsp)               # rfft2 real part
    Fs = (-np.sin(ang) * scale).reshape(M, Nsp)              # rfft2 imag part

    kk = np.arange(Wf)
    ck = np.where((kk == 0) | ((W % 2 == 0) & (kk == W // 2)), 1.0, 2.0)
    ckb = ck[None, :, None, None]
    Gc = (ckb * np.cos(ang) * scale).reshape(M, Nsp).T       # irfft2 on Re
    Gs = (-ckb * np.sin(ang) * scale).reshape(M, Nsp).T      # irfft2 on Im
    return (Fc.astype(np.float32), Fs.astype(np.float32),
            Gc.astype(np.float32), Gs.astype(np.float32))


def _prepare(x, complex_weight, g1, b1, g2, b2, w1, bm1, w2, bm2, gamma, H, W):
    """Host-side param prep: DFT stacking, weight folding, padding, bf16 casts."""
    B, N, C = x.shape
    Wf = W // 2 + 1
    M = H * Wf
    hidden = w1.shape[1]
    assert N == H * W and complex_weight.shape == (H, Wf, C, 2)

    Cp = _round_up(C, 128)     # lane-dense channels (masked LN keeps exactness)
    Hd = _round_up(hidden, 128)
    Mp = _round_up(M, 8)       # sublane-aligned spectral rows

    # --- stacked, zero-padded ortho-DFT operators (bf16 MXU operands) -------
    Fc, Fs, Gc, Gs = _make_dft_matrices(H, W)
    ffwd = np.zeros((2 * Mp, N), np.float32)
    ffwd[:M] = Fc
    ffwd[Mp:Mp + M] = Fs
    ginv = np.zeros((N, 2 * Mp), np.float32)
    ginv[:, :M] = Gc
    ginv[:, Mp:Mp + M] = Gs

    def pad2(a, rows, cols):
        return jnp.pad(a, ((0, rows - a.shape[0]), (0, cols - a.shape[1])))

    wre = pad2(complex_weight[..., 0].reshape(M, C).astype(jnp.float32), Mp, Cp)
    wim = pad2(complex_weight[..., 1].reshape(M, C).astype(jnp.float32), Mp, Cp)

    # --- fold norm2 affine into w1/bm1 and layer-scale gamma into w2/bm2 ----
    #   z @ w1 + bm1 = f_hat @ (g2[:,None]*w1) + (bm1 + b2 @ w1)
    #   (h @ w2 + bm2) * gamma = h @ (w2*gamma) + bm2*gamma
    w1f = g2[:, None].astype(jnp.float32) * w1.astype(jnp.float32)
    bm1f = bm1.astype(jnp.float32) + b2.astype(jnp.float32) @ w1.astype(jnp.float32)
    w2f = w2.astype(jnp.float32) * gamma[None, :].astype(jnp.float32)
    bm2f = bm2.astype(jnp.float32) * gamma.astype(jnp.float32)

    w1p = pad2(w1f, Cp, Hd).astype(jnp.bfloat16)
    w2p = pad2(w2f, Hd, Cp).astype(jnp.bfloat16)
    bm1p = pad2(bm1f.reshape(1, hidden), 1, Hd)
    bm2p = pad2(bm2f.reshape(1, C), 1, Cp)
    g1p = pad2(g1.reshape(1, C).astype(jnp.float32), 1, Cp)
    b1p = pad2(b1.reshape(1, C).astype(jnp.float32), 1, Cp)
    cmask = (jnp.arange(Cp) < C).astype(jnp.float32).reshape(1, Cp)

    params = [
        jnp.asarray(ffwd).astype(jnp.bfloat16),   # (2Mp, N)
        jnp.asarray(ginv).astype(jnp.bfloat16),   # (N, 2Mp)
        wre.astype(jnp.bfloat16),                 # (Mp, Cp)
        wim.astype(jnp.bfloat16),                 # (Mp, Cp)
        g1p, b1p, cmask,                          # (1, Cp) f32
        w1p, bm1p,                                # (Cp, Hd) bf16 / (1, Hd) f32
        w2p, bm2p,                                # (Hd, Cp) bf16 / (1, Cp) f32
    ]
    x_pad = jnp.pad(x.astype(jnp.float32), ((0, 0), (0, 0), (0, Cp - C)))
    meta = dict(B=B, N=N, C=C, Cp=Cp, Mp=Mp, Hd=Hd)
    return x_pad, params, meta


def block_forward(x, complex_weight, g1, b1, g2, b2, w1, bm1, w2, bm2, gamma,
                  *, H, W):
    """Pallas implementation of Block.forward.  x: (B, N, C) float32."""
    x_pad, params, meta = _prepare(x, complex_weight, g1, b1, g2, b2,
                                   w1, bm1, w2, bm2, gamma, H, W)
    B, N, C = meta["B"], meta["N"], meta["C"]
    Cp, Mp, Hd = meta["Cp"], meta["Mp"], meta["Hd"]

    in_specs = [pl.BlockSpec((1, N, Cp), lambda b: (b, 0, 0))]
    in_specs += [pl.BlockSpec(p.shape, lambda b: (0, 0)) for p in params]
    out_specs = pl.BlockSpec((1, N, Cp), lambda b: (b, 0, 0))

    # Explicit VMEM budget (perf review): double-buffered x/out blocks, the
    # pipeline-allocated constant operands (constant index_map -> never
    # re-fetched across grid steps), plus in-kernel intermediates, with ~2x
    # headroom.  Clamped to [16 MiB, 64 MiB] (v7x physical VMEM per core).
    blk_bytes = N * Cp * 4
    param_bytes = sum(int(p.size) * p.dtype.itemsize for p in params)
    interm_bytes = 4 * (8 * N * Cp + 6 * Mp * Cp + 3 * N * Hd)
    vmem_limit = int(min(max(2 * (4 * blk_bytes + 2 * param_bytes + interm_bytes),
                             16 * 1024 * 1024),
                         64 * 1024 * 1024))

    out = pl.pallas_call(
        functools.partial(_block_kernel, C, Mp),
        out_shape=jax.ShapeDtypeStruct((B, N, Cp), jnp.float32),
        grid_spec=pltpu.PrefetchScalarGridSpec(
            num_scalar_prefetch=0,
            grid=(B,),
            in_specs=in_specs,
            out_specs=out_specs,
        ),
        compiler_params=pltpu.CompilerParams(
            dimension_semantics=("parallel",),   # batch axis -> megacore/TC split
            vmem_limit_bytes=vmem_limit),
    )(x_pad, *params)
    return out[..., :C]


# ---------------------------- references -----------------------------------
def _ref_block_exact(x, complex_weight, g1, b1, g2, b2, w1, bm1, w2, bm2,
                     gamma, H, W):
    """Pure f32 reference with jnp.fft (torch module semantics)."""
    def ln(v, g, b):
        mu = v.mean(-1, keepdims=True)
        var = ((v - mu) ** 2).mean(-1, keepdims=True)
        return (v - mu) / jnp.sqrt(var + _LN_EPS) * g + b

    B, N, C = x.shape
    y = ln(x, g1, b1)
    y4 = y.reshape(B, H, W, C).astype(jnp.float32)
    Y = jnp.fft.rfft2(y4, axes=(1, 2), norm="ortho")
    Y = Y * (complex_weight[..., 0] + 1j * complex_weight[..., 1])
    f = jnp.fft.irfft2(Y, s=(H, W), axes=(1, 2), norm="ortho").reshape(B, N, C)
    z = ln(f, g2, b2)
    h = jax.nn.gelu(z @ w1 + bm1, approximate=False)
    o = h @ w2 + bm2
    return x + o * gamma


def _ref_block_matched(x, complex_weight, g1, b1, g2, b2, w1, bm1, w2, bm2,
                       gamma, H, W):
    """Precision-matched reference: the same folded/padded bf16 params and the
    same math as the kernel body, executed with plain XLA ops (validates the
    Pallas plumbing independently of the bf16 approximation error)."""
    x_pad, params, meta = _prepare(x, complex_weight, g1, b1, g2, b2,
                                   w1, bm1, w2, bm2, gamma, H, W)
    fn = lambda xb: _block_math(xb, *params, C=meta["C"], Mp=meta["Mp"])
    return jax.vmap(fn)(x_pad)[..., :meta["C"]]


if __name__ == "__main__":
    B, N, C = 2, 16, 32                      # B=2, seq N=16 (4x4 spatial), dim C=32
    H = W = int(math.sqrt(N))
    Wf = W // 2 + 1                          # GlobalFilter(dim=C, h=H, w=Wf)
    hidden = 4 * C

    key = jax.random.PRNGKey(0)
    ks = jax.random.split(key, 12)
    x = jax.random.normal(ks[0], (B, N, C), jnp.float32)

    complex_weight = 0.02 * jax.random.normal(ks[1], (H, Wf, C, 2), jnp.float32)
    g1 = 1.0 + 0.1 * jax.random.normal(ks[2], (C,), jnp.float32)
    b1 = 0.05 * jax.random.normal(ks[3], (C,), jnp.float32)
    g2 = 1.0 + 0.1 * jax.random.normal(ks[4], (C,), jnp.float32)
    b2 = 0.05 * jax.random.normal(ks[5], (C,), jnp.float32)
    w1 = 0.05 * jax.random.normal(ks[6], (C, hidden), jnp.float32)
    bm1 = 0.02 * jax.random.normal(ks[7], (hidden,), jnp.float32)
    w2 = 0.05 * jax.random.normal(ks[8], (hidden, C), jnp.float32)
    bm2 = 0.02 * jax.random.normal(ks[9], (C,), jnp.float32)
    gamma = 1e-5 * jnp.ones((C,), jnp.float32)   # init_values * ones(dim)

    args = (complex_weight, g1, b1, g2, b2, w1, bm1, w2, bm2)

    # --- module semantics (gamma = 1e-5): the bf16 error is scaled by 1e-5,
    #     so the comparison against the exact f32 FFT reference stays tight. --
    out = jax.block_until_ready(block_forward(x, *args, gamma, H=H, W=W))
    ref = _ref_block_exact(x, *args, gamma, H, W)
    np.testing.assert_allclose(np.asarray(out), np.asarray(ref),
                               rtol=1e-5, atol=2e-6)

    # --- residual branch at full scale (gamma = 1): tight against the
    #     precision-matched (bf16-operand) reference, loose (bf16 ballpark)
    #     against the exact f32 FFT reference. ------------------------------
    gamma_big = jnp.ones((C,), jnp.float32)
    out_big = jax.block_until_ready(
        block_forward(x, *args, gamma_big, H=H, W=W))
    ref_big_matched = _ref_block_matched(x, *args, gamma_big, H, W)
    np.testing.assert_allclose(np.asarray(out_big), np.asarray(ref_big_matched),
                               rtol=5e-3, atol=5e-4)
    ref_big_exact = _ref_block_exact(x, *args, gamma_big, H, W)
    np.testing.assert_allclose(np.asarray(out_big), np.asarray(ref_big_exact),
                               rtol=5e-2, atol=5e-2)

    print("KERNEL_OK")
</pallas_src>

<mosaic_0001>
module attributes {stable_mosaic.version = 11 : i64} {
  func.func @_block_kernel(%arg0: i32, %arg1: memref<1x16x128xf32, #tpu.memory_space<vmem>>, %arg2: memref<32x16xbf16, #tpu.memory_space<vmem>>, %arg3: memref<16x32xbf16, #tpu.memory_space<vmem>>, %arg4: memref<16x128xbf16, #tpu.memory_space<vmem>>, %arg5: memref<16x128xbf16, #tpu.memory_space<vmem>>, %arg6: memref<1x128xf32, #tpu.memory_space<vmem>>, %arg7: memref<1x128xf32, #tpu.memory_space<vmem>>, %arg8: memref<1x128xf32, #tpu.memory_space<vmem>>, %arg9: memref<128x128xbf16, #tpu.memory_space<vmem>>, %arg10: memref<1x128xf32, #tpu.memory_space<vmem>>, %arg11: memref<128x128xbf16, #tpu.memory_space<vmem>>, %arg12: memref<1x128xf32, #tpu.memory_space<vmem>>, %arg13: memref<1x16x128xf32, #tpu.memory_space<vmem>>) attributes {dimension_semantics = [#tpu.dimension_semantics<parallel>], iteration_bounds = array<i64: 2>, scalar_prefetch = 0 : i64, scratch_operands = 0 : i64, tpu.core_type = #tpu.core_type<tc>, window_params = [{transform_indices = @transform_0, window_bounds = array<i64: 1, 16, 128>}, {pipeline_mode = #tpu.pipeline_mode<synchronous>, transform_indices = @transform_1, window_bounds = array<i64: 32, 16>}, {pipeline_mode = #tpu.pipeline_mode<synchronous>, transform_indices = @transform_2, window_bounds = array<i64: 16, 32>}, {pipeline_mode = #tpu.pipeline_mode<synchronous>, transform_indices = @transform_3, window_bounds = array<i64: 16, 128>}, {pipeline_mode = #tpu.pipeline_mode<synchronous>, transform_indices = @transform_4, window_bounds = array<i64: 16, 128>}, {pipeline_mode = #tpu.pipeline_mode<synchronous>, transform_indices = @transform_5, window_bounds = array<i64: 1, 128>}, {pipeline_mode = #tpu.pipeline_mode<synchronous>, transform_indices = @transform_6, window_bounds = array<i64: 1, 128>}, {pipeline_mode = #tpu.pipeline_mode<synchronous>, transform_indices = @transform_7, window_bounds = array<i64: 1, 128>}, {pipeline_mode = #tpu.pipeline_mode<synchronous>, transform_indices = @transform_8, window_bounds = array<i64: 128, 128>}, {pipeline_mode = #tpu.pipeline_mode<synchronous>, transform_indices = @transform_9, window_bounds = array<i64: 1, 128>}, {pipeline_mode = #tpu.pipeline_mode<synchronous>, transform_indices = @transform_10, window_bounds = array<i64: 128, 128>}, {pipeline_mode = #tpu.pipeline_mode<synchronous>, transform_indices = @transform_11, window_bounds = array<i64: 1, 128>}, {transform_indices = @transform_12, window_bounds = array<i64: 1, 16, 128>}]} {
    %c0 = arith.constant 0 : index
    %c0_0 = arith.constant 0 : index
    %c0_1 = arith.constant 0 : index
    %0 = vector.load %arg1[%c0, %c0_0, %c0_1] : memref<1x16x128xf32, #tpu.memory_space<vmem>>, vector<1x16x128xf32>
    %1 = vector.shape_cast %0 : vector<1x16x128xf32> to vector<16x128xf32>
    %c0_2 = arith.constant 0 : index
    %c0_3 = arith.constant 0 : index
    %2 = vector.load %arg2[%c0_2, %c0_3] : memref<32x16xbf16, #tpu.memory_space<vmem>>, vector<32x16xbf16>
    %c0_4 = arith.constant 0 : index
    %c0_5 = arith.constant 0 : index
    %3 = vector.load %arg3[%c0_4, %c0_5] : memref<16x32xbf16, #tpu.memory_space<vmem>>, vector<16x32xbf16>
    %c0_6 = arith.constant 0 : index
    %c0_7 = arith.constant 0 : index
    %4 = vector.load %arg4[%c0_6, %c0_7] : memref<16x128xbf16, #tpu.memory_space<vmem>>, vector<16x128xbf16>
    %c0_8 = arith.constant 0 : index
    %c0_9 = arith.constant 0 : index
    %5 = vector.load %arg5[%c0_8, %c0_9] : memref<16x128xbf16, #tpu.memory_space<vmem>>, vector<16x128xbf16>
    %c0_10 = arith.constant 0 : index
    %c0_11 = arith.constant 0 : index
    %6 = vector.load %arg6[%c0_10, %c0_11] : memref<1x128xf32, #tpu.memory_space<vmem>>, vector<1x128xf32>
    %c0_12 = arith.constant 0 : index
    %c0_13 = arith.constant 0 : index
    %7 = vector.load %arg7[%c0_12, %c0_13] : memref<1x128xf32, #tpu.memory_space<vmem>>, vector<1x128xf32>
    %c0_14 = arith.constant 0 : index
    %c0_15 = arith.constant 0 : index
    %8 = vector.load %arg8[%c0_14, %c0_15] : memref<1x128xf32, #tpu.memory_space<vmem>>, vector<1x128xf32>
    %c0_16 = arith.constant 0 : index
    %c0_17 = arith.constant 0 : index
    %9 = vector.load %arg9[%c0_16, %c0_17] : memref<128x128xbf16, #tpu.memory_space<vmem>>, vector<128x128xbf16>
    %c0_18 = arith.constant 0 : index
    %c0_19 = arith.constant 0 : index
    %10 = vector.load %arg10[%c0_18, %c0_19] : memref<1x128xf32, #tpu.memory_space<vmem>>, vector<1x128xf32>
    %c0_20 = arith.constant 0 : index
    %c0_21 = arith.constant 0 : index
    %11 = vector.load %arg11[%c0_20, %c0_21] : memref<128x128xbf16, #tpu.memory_space<vmem>>, vector<128x128xbf16>
    %c0_22 = arith.constant 0 : index
    %c0_23 = arith.constant 0 : index
    %12 = vector.load %arg12[%c0_22, %c0_23] : memref<1x128xf32, #tpu.memory_space<vmem>>, vector<1x128xf32>
    %cst = arith.constant dense<0.000000e+00> : vector<16xf32>
    %13 = vector.multi_reduction <add>, %1, %cst [1] : vector<16x128xf32> to vector<16xf32>
    %14 = vector.shape_cast %13 : vector<16xf32> to vector<16x1xf32>
    %cst_24 = arith.constant 3.125000e-02 : f32
    %15 = vector.broadcast %cst_24 : f32 to vector<16x1xf32>
    %16 = arith.mulf %14, %15 : vector<16x1xf32>
    %17 = vector.broadcast %16 : vector<16x1xf32> to vector<16x128xf32>
    %18 = arith.subf %1, %17 : vector<16x128xf32>
    %19 = vector.broadcast %8 : vector<1x128xf32> to vector<16x128xf32>
    %20 = arith.mulf %18, %19 : vector<16x128xf32>
    %21 = arith.mulf %20, %20 : vector<16x128xf32>
    %cst_25 = arith.constant dense<0.000000e+00> : vector<16xf32>
    %22 = vector.multi_reduction <add>, %21, %cst_25 [1] : vector<16x128xf32> to vector<16xf32>
    %23 = vector.shape_cast %22 : vector<16xf32> to vector<16x1xf32>
    %cst_26 = arith.constant 3.125000e-02 : f32
    %24 = vector.broadcast %cst_26 : f32 to vector<16x1xf32>
    %25 = arith.mulf %23, %24 : vector<16x1xf32>
    %cst_27 = arith.constant 9.99999974E-6 : f32
    %26 = vector.broadcast %cst_27 : f32 to vector<16x1xf32>
    %27 = arith.addf %25, %26 : vector<16x1xf32>
    %28 = math.rsqrt %27 : vector<16x1xf32>
    %29 = vector.broadcast %28 : vector<16x1xf32> to vector<16x128xf32>
    %30 = arith.mulf %20, %29 : vector<16x128xf32>
    %31 = vector.broadcast %6 : vector<1x128xf32> to vector<16x128xf32>
    %32 = arith.mulf %30, %31 : vector<16x128xf32>
    %33 = vector.broadcast %7 : vector<1x128xf32> to vector<16x128xf32>
    %34 = arith.addf %32, %33 : vector<16x128xf32>
    %35 = arith.truncf %34 : vector<16x128xf32> to vector<16x128xbf16>
    %cst_28 = arith.constant dense<0.000000e+00> : vector<32x128xf32>
    %36 = tpu.matmul %2, %35, %cst_28 {dimension_numbers = #tpu.dot_dimension_numbers<[1], [0], [0], [1], [0, 0, 1, 1], [], []>} : vector<32x16xbf16>, vector<16x128xbf16>, vector<32x128xf32> -> vector<32x128xf32>
    %37 = vector.extract_strided_slice %36 {offsets = [0, 0], sizes = [16, 128], strides = [1, 1]} : vector<32x128xf32> to vector<16x128xf32>
    %38 = vector.extract_strided_slice %36 {offsets = [16, 0], sizes = [16, 128], strides = [1, 1]} : vector<32x128xf32> to vector<16x128xf32>
    %39 = arith.extf %4 : vector<16x128xbf16> to vector<16x128xf32>
    %40 = arith.extf %5 : vector<16x128xbf16> to vector<16x128xf32>
    %41 = arith.mulf %37, %39 : vector<16x128xf32>
    %42 = arith.mulf %38, %40 : vector<16x128xf32>
    %43 = arith.subf %41, %42 : vector<16x128xf32>
    %44 = arith.mulf %37, %40 : vector<16x128xf32>
    %45 = arith.mulf %38, %39 : vector<16x128xf32>
    %46 = arith.addf %44, %45 : vector<16x128xf32>
    %47 = tpu.concatenate %43, %46 in 0 : vector<16x128xf32>, vector<16x128xf32> -> vector<32x128xf32>
    %48 = arith.truncf %47 : vector<32x128xf32> to vector<32x128xbf16>
    %cst_29 = arith.constant dense<0.000000e+00> : vector<16x128xf32>
    %49 = tpu.matmul %3, %48, %cst_29 {dimension_numbers = #tpu.dot_dimension_numbers<[1], [0], [0], [1], [0, 0, 1, 1], [], []>} : vector<16x32xbf16>, vector<32x128xbf16>, vector<16x128xf32> -> vector<16x128xf32>
    %cst_30 = arith.constant dense<0.000000e+00> : vector<16xf32>
    %50 = vector.multi_reduction <add>, %49, %cst_30 [1] : vector<16x128xf32> to vector<16xf32>
    %51 = vector.shape_cast %50 : vector<16xf32> to vector<16x1xf32>
    %cst_31 = arith.constant 3.125000e-02 : f32
    %52 = vector.broadcast %cst_31 : f32 to vector<16x1xf32>
    %53 = arith.mulf %51, %52 : vector<16x1xf32>
    %54 = vector.broadcast %53 : vector<16x1xf32> to vector<16x128xf32>
    %55 = arith.subf %49, %54 : vector<16x128xf32>
    %56 = vector.broadcast %8 : vector<1x128xf32> to vector<16x128xf32>
    %57 = arith.mulf %55, %56 : vector<16x128xf32>
    %58 = arith.mulf %57, %57 : vector<16x128xf32>
    %cst_32 = arith.constant dense<0.000000e+00> : vector<16xf32>
    %59 = vector.multi_reduction <add>, %58, %cst_32 [1] : vector<16x128xf32> to vector<16xf32>
    %60 = vector.shape_cast %59 : vector<16xf32> to vector<16x1xf32>
    %cst_33 = arith.constant 3.125000e-02 : f32
    %61 = vector.broadcast %cst_33 : f32 to vector<16x1xf32>
    %62 = arith.mulf %60, %61 : vector<16x1xf32>
    %cst_34 = arith.constant 9.99999974E-6 : f32
    %63 = vector.broadcast %cst_34 : f32 to vector<16x1xf32>
    %64 = arith.addf %62, %63 : vector<16x1xf32>
    %65 = math.rsqrt %64 : vector<16x1xf32>
    %66 = vector.broadcast %65 : vector<16x1xf32> to vector<16x128xf32>
    %67 = arith.mulf %57, %66 : vector<16x128xf32>
    %68 = arith.truncf %67 : vector<16x128xf32> to vector<16x128xbf16>
    %cst_35 = arith.constant dense<0.000000e+00> : vector<16x128xf32>
    %69 = tpu.matmul %68, %9, %cst_35 {dimension_numbers = #tpu.dot_dimension_numbers<[1], [0], [0], [1], [0, 0, 1, 1], [], []>} : vector<16x128xbf16>, vector<128x128xbf16>, vector<16x128xf32> -> vector<16x128xf32>
    %70 = vector.broadcast %10 : vector<1x128xf32> to vector<16x128xf32>
    %71 = arith.addf %69, %70 : vector<16x128xf32>
    %cst_36 = arith.constant 5.000000e-01 : f32
    %72 = vector.broadcast %cst_36 : f32 to vector<16x128xf32>
    %73 = arith.mulf %72, %71 : vector<16x128xf32>
    %cst_37 = arith.constant 0.707106769 : f32
    %74 = vector.broadcast %cst_37 : f32 to vector<16x128xf32>
    %75 = arith.mulf %71, %74 : vector<16x128xf32>
    %76 = math.absf %75 : vector<16x128xf32>
    %cst_38 = arith.constant 0.327591091 : f32
    %77 = vector.broadcast %cst_38 : f32 to vector<16x128xf32>
    %78 = arith.mulf %77, %76 : vector<16x128xf32>
    %cst_39 = arith.constant 1.000000e+00 : f32
    %79 = vector.broadcast %cst_39 : f32 to vector<16x128xf32>
    %80 = arith.addf %79, %78 : vector<16x128xf32>
    %cst_40 = arith.constant 1.000000e+00 : f32
    %81 = vector.broadcast %cst_40 : f32 to vector<16x128xf32>
    %82 = arith.divf %81, %80 : vector<16x128xf32>
    %cst_41 = arith.constant 1.06140542 : f32
    %83 = vector.broadcast %cst_41 : f32 to vector<16x128xf32>
    %84 = arith.mulf %83, %82 : vector<16x128xf32>
    %cst_42 = arith.constant -1.45315206 : f32
    %85 = vector.broadcast %cst_42 : f32 to vector<16x128xf32>
    %86 = arith.addf %84, %85 : vector<16x128xf32>
    %87 = arith.mulf %86, %82 : vector<16x128xf32>
    %cst_43 = arith.constant 1.42141378 : f32
    %88 = vector.broadcast %cst_43 : f32 to vector<16x128xf32>
    %89 = arith.addf %87, %88 : vector<16x128xf32>
    %90 = arith.mulf %89, %82 : vector<16x128xf32>
    %cst_44 = arith.constant -0.284496725 : f32
    %91 = vector.broadcast %cst_44 : f32 to vector<16x128xf32>
    %92 = arith.addf %90, %91 : vector<16x128xf32>
    %93 = arith.mulf %92, %82 : vector<16x128xf32>
    %cst_45 = arith.constant 0.254829586 : f32
    %94 = vector.broadcast %cst_45 : f32 to vector<16x128xf32>
    %95 = arith.addf %93, %94 : vector<16x128xf32>
    %96 = arith.mulf %95, %82 : vector<16x128xf32>
    %cst_46 = arith.constant 0.000000e+00 : f32
    %97 = vector.broadcast %cst_46 : f32 to vector<16x128xf32>
    %98 = arith.subf %97, %76 : vector<16x128xf32>
    %99 = arith.mulf %98, %76 : vector<16x128xf32>
    %100 = math.exp %99 : vector<16x128xf32>
    %101 = arith.mulf %96, %100 : vector<16x128xf32>
    %cst_47 = arith.constant 1.000000e+00 : f32
    %102 = vector.broadcast %cst_47 : f32 to vector<16x128xf32>
    %103 = arith.subf %102, %101 : vector<16x128xf32>
    %cst_48 = arith.constant 0.000000e+00 : f32
    %104 = vector.broadcast %cst_48 : f32 to vector<16x128xf32>
    %105 = arith.cmpf oge, %75, %104 : vector<16x128xf32>
    %cst_49 = arith.constant 0.000000e+00 : f32
    %106 = vector.broadcast %cst_49 : f32 to vector<16x128xf32>
    %107 = arith.subf %106, %103 : vector<16x128xf32>
    %108 = arith.select %105, %103, %107 : vector<16x128xi1>, vector<16x128xf32>
    %cst_50 = arith.constant 1.000000e+00 : f32
    %109 = vector.broadcast %cst_50 : f32 to vector<16x128xf32>
    %110 = arith.addf %109, %108 : vector<16x128xf32>
    %111 = arith.mulf %73, %110 : vector<16x128xf32>
    %112 = arith.truncf %111 : vector<16x128xf32> to vector<16x128xbf16>
    %cst_51 = arith.constant dense<0.000000e+00> : vector<16x128xf32>
    %113 = tpu.matmul %112, %11, %cst_51 {dimension_numbers = #tpu.dot_dimension_numbers<[1], [0], [0], [1], [0, 0, 1, 1], [], []>} : vector<16x128xbf16>, vector<128x128xbf16>, vector<16x128xf32> -> vector<16x128xf32>
    %114 = vector.broadcast %12 : vector<1x128xf32> to vector<16x128xf32>
    %115 = arith.addf %113, %114 : vector<16x128xf32>
    %116 = arith.addf %1, %115 : vector<16x128xf32>
    %c0_52 = arith.constant 0 : index
    %c0_53 = arith.constant 0 : index
    %c0_54 = arith.constant 0 : index
    %117 = vector.load %arg13[%c0_52, %c0_53, %c0_54] : memref<1x16x128xf32, #tpu.memory_space<vmem>>, vector<1x16x128xf32>
    %118 = vector.shape_cast %117 : vector<1x16x128xf32> to vector<16x128xf32>
    %119 = vector.shape_cast %116 : vector<16x128xf32> to vector<1x16x128xf32>
    tpu.vector_store %arg13[%c0_52, %c0_53, %c0_54], %119 {strides = array<i32>} : memref<1x16x128xf32, #tpu.memory_space<vmem>>, vector<1x16x128xf32>,
    return
  }
  func.func @transform_0(%arg0: i32) -> (i32, i32, i32) {
    %c0_i32 = arith.constant 0 : i32
    %c0_i32_0 = arith.constant 0 : i32
    %c0_i32_1 = arith.constant 0 : i32
    return %arg0, %c0_i32, %c0_i32_0 : i32, i32, i32
  }
  func.func @transform_1(%arg0: i32) -> (i32, i32) {
    %c0_i32 = arith.constant 0 : i32
    %c0_i32_0 = arith.constant 0 : i32
    %c0_i32_1 = arith.constant 0 : i32
    return %c0_i32, %c0_i32_0 : i32, i32
  }
  func.func @transform_2(%arg0: i32) -> (i32, i32) {
    %c0_i32 = arith.constant 0 : i32
    %c0_i32_0 = arith.constant 0 : i32
    %c0_i32_1 = arith.constant 0 : i32
    return %c0_i32, %c0_i32_0 : i32, i32
  }
  func.func @transform_3(%arg0: i32) -> (i32, i32) {
    %c0_i32 = arith.constant 0 : i32
    %c0_i32_0 = arith.constant 0 : i32
    %c0_i32_1 = arith.constant 0 : i32
    return %c0_i32, %c0_i32_0 : i32, i32
  }
  func.func @transform_4(%arg0: i32) -> (i32, i32) {
    %c0_i32 = arith.constant 0 : i32
    %c0_i32_0 = arith.constant 0 : i32
    %c0_i32_1 = arith.constant 0 : i32
    return %c0_i32, %c0_i32_0 : i32, i32
  }
  func.func @transform_5(%arg0: i32) -> (i32, i32) {
    %c0_i32 = arith.constant 0 : i32
    %c0_i32_0 = arith.constant 0 : i32
    %c0_i32_1 = arith.constant 0 : i32
    return %c0_i32, %c0_i32_0 : i32, i32
  }
  func.func @transform_6(%arg0: i32) -> (i32, i32) {
    %c0_i32 = arith.constant 0 : i32
    %c0_i32_0 = arith.constant 0 : i32
    %c0_i32_1 = arith.constant 0 : i32
    return %c0_i32, %c0_i32_0 : i32, i32
  }
  func.func @transform_7(%arg0: i32) -> (i32, i32) {
    %c0_i32 = arith.constant 0 : i32
    %c0_i32_0 = arith.constant 0 : i32
    %c0_i32_1 = arith.constant 0 : i32
    return %c0_i32, %c0_i32_0 : i32, i32
  }
  func.func @transform_8(%arg0: i32) -> (i32, i32) {
    %c0_i32 = arith.constant 0 : i32
    %c0_i32_0 = arith.constant 0 : i32
    %c0_i32_1 = arith.constant 0 : i32
    return %c0_i32, %c0_i32_0 : i32, i32
  }
  func.func @transform_9(%arg0: i32) -> (i32, i32) {
    %c0_i32 = arith.constant 0 : i32
    %c0_i32_0 = arith.constant 0 : i32
    %c0_i32_1 = arith.constant 0 : i32
    return %c0_i32, %c0_i32_0 : i32, i32
  }
  func.func @transform_10(%arg0: i32) -> (i32, i32) {
    %c0_i32 = arith.constant 0 : i32
    %c0_i32_0 = arith.constant 0 : i32
    %c0_i32_1 = arith.constant 0 : i32
    return %c0_i32, %c0_i32_0 : i32, i32
  }
  func.func @transform_11(%arg0: i32) -> (i32, i32) {
    %c0_i32 = arith.constant 0 : i32
    %c0_i32_0 = arith.constant 0 : i32
    %c0_i32_1 = arith.constant 0 : i32
    return %c0_i32, %c0_i32_0 : i32, i32
  }
  func.func @transform_12(%arg0: i32) -> (i32, i32, i32) {
    %c0_i32 = arith.constant 0 : i32
    %c0_i32_0 = arith.constant 0 : i32
    %c0_i32_1 = arith.constant 0 : i32
    return %arg0, %c0_i32, %c0_i32_0 : i32, i32, i32
  }
}

</mosaic_0001>

<bundles_post_ra>
// kernel: tpu_custom_call.1
= control target key start
LH: loop header
LB: loop body
LE: loop exit
PB: predicated region body
PF: predicated region fallthrough
CT: control target
= control target key end

     0   :  { %s1678_s0 = inlined_call_operand.hbm [shape: f32[2,16,128], index: 0, kind: input, shape index: {}]   ;;  %s1679_s1 = inlined_call_operand.vmem [shape: bf16[32,16], index: 1, kind: input, shape index: {}]   ;;  %s1680_s2 = inlined_call_operand.vmem [shape: bf16[16,32], index: 2, kind: input, shape index: {}]   ;;  %s1681_s3 = inlined_call_operand.vmem [shape: bf16[16,128], index: 3, kind: input, shape index: {}]   ;;  %s1682_s4 = inlined_call_operand.vmem [shape: bf16[16,128], index: 4, kind: input, shape index: {}]   ;;  %s1683_s5 = inlined_call_operand.vmem [shape: f32[1,128], index: 5, kind: input, shape index: {}]   ;;  %s1684_s6 = inlined_call_operand.vmem [shape: f32[1,128], index: 6, kind: input, shape index: {}]   ;;  %s1685_s7 = inlined_call_operand.vmem [shape: f32[1,128], index: 7, kind: input, shape index: {}]   ;;  %s1686_s8 = inlined_call_operand.hbm [shape: bf16[128,128], index: 8, kind: input, shape index: {}]   ;;  %s1687_s9 = inlined_call_operand.vmem [shape: f32[1,128], index: 9, kind: input, shape index: {}]   ;;  %s1688_s10 = inlined_call_operand.hbm [shape: bf16[128,128], index: 10, kind: input, shape index: {}]   ;;  %s1689_s11 = inlined_call_operand.vmem [shape: f32[1,128], index: 11, kind: input, shape index: {}]   ;;  %s1690_s12 = inlined_call_operand.hbm [shape: f32[2,16,128], index: 12, kind: output, shape index: {}]  }
   0x1   :  { %1695 = sst [smem:[#allocation16_spill]] %s1686_s8 }
   0x2   :  { %1696 = sst [smem:[#allocation17_spill]] %s1688_s10 }
   0x3   :  { %17 = vsyncpa [#allocation3], 0 }
   0x4   :  { %19 = vsyncpa [#allocation3 + $0x1], 0 }
   0x5   :  { %20 = vsyncpa [#allocation6], 0 }
   0x6   :  { %21 = vsyncpa [#allocation4], 0 }
   0x7   :  { %23 = vsyncpa [#allocation4 + $0x1], 0  ;;  %s1471_s21 = smov 0   ;;  %s1473_s22 = smov 0  }
   0x8   :  { %s1475_s23 = smov 0   ;;  %s1477_s24 = smov 0  }
   0x9 LB: > { %1697 = sst [smem:[#allocation12_spill]] %s1392_s23  ;;  %s1492_s25 = sadd.s32 4294967295, %s1396_s24   ;;  %s1396_s24 = sphi %s1477_s24, %s1710_s24   ;;  %s1392_s23 = sphi %s1475_s23, %s1715_s23   ;;  %s1388_s22 = sphi %s1473_s22, %s1714_s22   ;;  %s1384_s21 = sphi %s1471_s21, %s1713_s21  }
   0xa   : > { %s1016_s26 = sadd.s32 4294967294, %s1396_s24   ;;  %p49_p0 = scmp.ne.s32.totalorder %s1388_s22, %s1384_s21 }
   0xb   : > { %p50_p1 = scmp.eq.s32.totalorder %s1492_s25, 0  ;;  %p304_p2 = scmp.eq.s32.totalorder %s1492_s25, 1 }
   0xc   : > { %p310_p3 = scmp.eq.s32.totalorder %s1016_s26, 1  ;;  %p1017_p5 = scmp.ge.s32.totalorder %s1396_s24, 1 }
   0xd   : > { %p1501_p4 = por %p50_p1, %p49_p0  ;;  %p317_p7 = scmp.lt.s32.totalorder %s1396_s24, 3 }
   0xe   : > { %p1506_p6 = por %p310_p3, %p49_p0  ;;  %s1701_s8 = sld [smem:[#allocation16_spill]] }
   0xf   : > { %p1514_p8 = pnand %p1017_p5, %p317_p7  ;;  %s1398_s15 = smov [#allocation5]  }
  0x10   : > { %s1699_s28 = scalar_select %p1506_p6, 1, 0 }
  0x11   : > { %p1154_p9 = pneg %p1514_p8  ;;  %s351_s16 = sshll.u32 %s1398_s15, 4  ;;  %s352_s16 = int_to_ptr.vmem [resolvable:$true] %s351_s16 }
  0x12   : > { %1700 = sst [smem:[#allocation13_spill]] %s1699_s28  ;;  %s1399_s20 = smov 64  }
  0x13   : > { %p1155_p10 = pnand %p1154_p9, %p50_p1  ;;  %s1703_s10 = sld [smem:[#allocation17_spill]] }
  0x14   : > { %s349_s13 = sshll.u32 %s1701_s8, 4  ;;  %s1400_s26 = smov 4   ;;  %s350_s13 = int_to_ptr.hbm [resolvable:$true] %s349_s13 }
  0x15   : > { %1157 = dma.hbm_to_vmem [thread:$0]  (!%p1155_p10), %s350_s13, 1024, %s352_s16, [#allocation6], %s1399_s20, %s1399_s20, %s1400_s26  }
  0x16   : > { %s1401_s29 = smov [#allocation7]   ;;  %s1527_s15 = sadd.s32 1, %s1396_s24  }
  0x17   : > { %s368_s30 = sshll.u32 %s1401_s29, 4  ;;  %1704 = sst [smem:[#allocation14_spill]] %s1527_s15  ;;  %s369_s30 = int_to_ptr.vmem [resolvable:$true] %s368_s30 }
  0x18   : > { %s36_s8 = sadd.s32 1, %s1392_s23  ;;  %s33_s28 = ssub.s32 %s1396_s24, %s1527_s15 }
  0x19   : > { %s366_s19 = sshll.u32 %s1703_s10, 4  ;;  %p43_p12 = scmp.ne.s32.totalorder %s1392_s23, %s1388_s22  ;;  %s367_s19 = int_to_ptr.hbm [resolvable:$true] %s366_s19 }
  0x1a   : > { %1160 = dma.hbm_to_vmem [thread:$0]  (!%p1155_p10), %s367_s19, 1024, %s369_s30, [#allocation6], %s1399_s20, %s1399_s20, %s1400_s26  }
  0x1b   : > { %p34_p13 = scmp.eq.s32.totalorder %s33_s28, 0  ;;  %p44_p0 = scmp.eq.s32.totalorder %s1396_s24, 0 }
  0x1c   : > { %p1537_p3 = por %p304_p2, %p43_p12  ;;  %p1171_p5 = scmp.lt.s32.totalorder %s1396_s24, 2 }
  0x1d   : > { %s1543_s13 = scalar_select %p34_p13, %s1392_s23, %s36_s8  }
  0x1e   : > { %p45_p7 = por %p44_p0, %p43_p12  ;;  %s385_s16 = sand.u32 1, %s1392_s23  }
  0x1f   : > { %1706 = sst [smem:[#allocation15_spill]] %s1543_s13  ;;  %s1021_s18 = sshll.u32 %s385_s16, 4 }
  0x20   : > { %s1113_s19 = sshll.u32 %s1396_s24, 4  ;;  %s389_s30 = scalar_lea.vmem [#allocation2], %s1021_s18 }
  0x21   : > { %s394_s29 = scalar_lea.hbm %s1678_s0, %s1113_s19  ;;  %s397_s10 = sshll.u32 %s389_s30, 4  ;;  %s398_s10 = int_to_ptr.vmem [resolvable:$true] %s397_s10 }
  0x22   : > { %s395_s28 = sshll.u32 %s394_s29, 4  ;;  %p1550_p2 = pnand %p1171_p5, %p45_p7  ;;  %s396_s28 = int_to_ptr.hbm [resolvable:$true] %s395_s28 }
  0x23   : > { %s386_s8 = scalar_lea.sflag [#allocation3], %s385_s16  ;;  %s1296_s13 = sshra.s32 %s396_s28, 4  ;;  %s1297_s13 = int_to_ptr.hbm [resolvable:$true] %s1296_s13 }
  0x24   : > { %s1298_s23 = scalar_lea.hbm %s1297_s13, 16  ;;  %p1300_p10 = pneg %p1550_p2 }
  0x25   : > { %p1299_p9 = scmp.ne.s32.totalorder %s1297_s13, %s1298_s23  ;;  %s1303_s20 = scalar_lea.hbm %s1678_s0, 32 }
  0x26   : > { %p1304_p0 = scmp.lt.s32.totalorder %s1297_s13, %s1678_s0  ;;  %p1305_p5 = scmp.lt.s32.totalorder %s1303_s20, %s1298_s23 }
  0x27   : > { %p1301_p12 = pnand %p1300_p10, %p1299_p9 }
  0x28   : > { %p1306_p7 = por %p1305_p5, %p1304_p0 }
  0x29   : > { %p1302_p13 = pneg %p1301_p12 }
  0x2b   : > { %p1307_p11 = pnand %p1306_p7, %p1302_p13 }
  0x2d   : > { %1310 = shalt.err (!%p1307_p11)
}
  0x2e   : > { %s1402_s16 = smov 128   ;;  %s1403_s30 = smov 8  }
  0x2f   : > { %1164 = dma.hbm_to_vmem [thread:$0]  (!%p1550_p2), %s396_s28, 256, %s398_s10, %s386_s8, %s1402_s16, %s1402_s16, %s1403_s30  }
  0x30   : > { %409 = sbr.rel (%p1514_p8) target bundleno = 1247 (0x4df), region = 68  ;;  %s1567_s19 = sand.u32 (!%p1514_p8), 1, %s1388_s22  }
  0x31   : > { %s1025_s13 = sshll.u32 (!%p1514_p8), %s1567_s19, 4  ;;  %s412_s23 = scalar_lea.sflag (!%p1514_p8), [#allocation3], %s1567_s19 }
  0x32   : > { %s415_s18 = scalar_lea.vmem (!%p1514_p8), [#allocation2], %s1025_s13 }
  0x35   : > { %1371 = dma.done.wait (%p1501_p4), %s412_s23, 256  }
  0x36   : > { %1373 = vsyncadd (%p1501_p4), %s412_s23, 4294967040 }
  0x37   : > { %1375 = dma.done.wait (%p50_p1), [#allocation6], 2048  }
  0x38   : > { %1377 = vsyncadd (%p50_p1), [#allocation6], 4294965248  ;;  %v1581_v0 = vld [vmem:[%s415_s18] sm:$0xff]  ;;  %v1584_v1 = vld [vmem:[%s415_s18 + $0x8] sm:$0xff]  ;;  %vm583_vm6 = vcmask 130048   ;;  %vm632_vm7 = vcmask 261120  }
  0x39   : > { %517 = vadd.xlane.f32.xlu0 %v1581_v0  ;;  %v1590_v4 = vld [vmem:[%s1685_s7] ss:$0 sm:$0xff]  ;;  %v1115_v43 = vld [vmem:[%s1679_s1 + $0x8] sm:$0xff]  ;;  %s1133_s26 = sshll.u32 %s1492_s25, 4  ;;  %s466_s23 = scalar_lea.vmem [#allocation8], %s1025_s13 }
  0x3a   : > { %v1216_v32 = vld [vmem:[%s1683_s5] ss:$0 sm:$0xff]  ;;  %s920_s30 = scalar_lea.hbm %s1690_s12, %s1133_s26  ;;  %s921_s18 = sshll.u32 %s466_s23, 4  ;;  %s922_s18 = int_to_ptr.vmem [resolvable:$true] %s921_s18 }
  0x3b   : > { %v1217_v37 = vld [vmem:[%s1684_s6] ss:$0 sm:$0xff]  ;;  %s923_s10 = sshll.u32 %s920_s30, 4  ;;  %s909_s25 = scalar_lea.sflag [#allocation4], %s1567_s19  ;;  %s924_s10 = int_to_ptr.hbm [resolvable:$true] %s923_s10 }
  0x3c   : > { %v1114_v42 = vld [vmem:[%s1679_s1] sm:$0xff]  ;;  %s1340_s14 = sshra.s32 %s924_s10, 4  ;;  %s1346_s28 = scalar_lea.hbm %s1690_s12, 32  ;;  %s1341_s14 = int_to_ptr.hbm [resolvable:$true] %s1340_s14 }
  0x3d   : > { %v1135_v47 = vld [vmem:[%s1681_s3] sm:$0xff]   ;;  %s1342_s27 = scalar_lea.hbm %s1341_s14, 16  ;;  %p1347_p11 = scmp.lt.s32.totalorder %s1341_s14, %s1690_s12 }
  0x3e   : > { %v1139_v48 = vld [vmem:[%s1682_s4] sm:$0xff]   ;;  %v1136_v49 = vunpack.c.l.bf16 %v1135_v47  ;;  %v1137_v52 = vunpack.c.h.bf16 %v1135_v47  ;;  %p1343_p1 = scmp.ne.s32.totalorder %s1341_s14, %s1342_s27  ;;  %p1348_p2 = scmp.lt.s32.totalorder %s1346_s28, %s1342_s27 }
  0x3f   : > { %v1140_v50 = vunpack.c.l.bf16 %v1139_v48  ;;  %v1141_v51 = vunpack.c.h.bf16 %v1139_v48 }
  0x40   : > { %p1344_p4 = pnand %p1343_p1, %p1537_p3  ;;  %p1349_p9 = por %p1348_p2, %p1347_p11 }
  0x41   : > { %519 = vadd.xlane.f32.xlu0 %v1584_v1 }
  0x42   : > { %p1345_p8 = pneg %p1344_p4 }
  0x44   : > { %p1350_p10 = pnand %p1349_p9, %p1345_p8 }
  0xac   : > { %v518_v2 = vpop.xlane.xlu0 %517 }
  0xad   : > { %v521_v3 = vmul.f32 0.03125, %v518_v2 }
  0xaf   : > { %v523_v5 = vsub.f32 %v1581_v0, %v521_v3 }
  0xb1   : > { %v528_v6 = vmul.f32 %v1590_v4, %v523_v5 }
  0xb3   : > { %v530_v7 = vmul.f32 %v528_v6, %v528_v6 }
  0xb4   : > { %v520_v8 = vpop.xlane.xlu0 %519 }
  0xb5   : > { %v522_v9 = vmul.f32 0.03125, %v520_v8  ;;  %532 = vadd.xlane.f32.xlu1 %v530_v7  ;;  %v1116_v7 = vld [vmem:[%s1680_s2] sm:$0xff] }
  0xb7   : > { %v524_v10 = vsub.f32 %v1584_v1, %v522_v9 }
  0xb9   : > { %v529_v11 = vmul.f32 %v1590_v4, %v524_v10 }
  0xbb   : > { %v531_v12 = vmul.f32 %v529_v11, %v529_v11 }
  0xbd   : > { %534 = vadd.xlane.f32.xlu1 %v531_v12 }
 0x128   : > { %v533_v13 = vpop.xlane.xlu1 %532 }
 0x129   : > { %v536_v14 = vmul.f32 0.03125, %v533_v13 }
 0x12b   : > { %v538_v15 = vadd.f32 1e-05, %v536_v14 }
 0x12d   : > { %1220 = vrsqrt.f32 %v538_v15  ;;  %vm546_vm1 = vweird.f32 %v538_v15 }
 0x130   : > { %v535_v16 = vpop.xlane.xlu1 %534 }
 0x131   : > { %v537_v17 = vmul.f32 0.03125, %v535_v16 }
 0x133   : > { %v1221_v18 = vpop.eup %1220  ;;  %v539_v19 = vadd.f32 1e-05, %v537_v17 }
 0x134   : > { %v541_v20 = vmul.f32 %v1221_v18, %v538_v15  ;;  %vm547_vm0 = vweird.f32 %v1221_v18 }
 0x135   : > { %1222 = vrsqrt.f32 %v539_v19  ;;  %vm548_vm2 = vmor %vm546_vm1, %vm547_vm0  ;;  %vm556_vm4 = vweird.f32 %v539_v19 }
 0x136   : > { %v542_v21 = vmul.f32 %v1221_v18, %v541_v20  ;;  %v1124_v20 = vld [vmem:[#allocation5 + $0x38] sm:$0xff] }
 0x137   : > { %744 = vmatpush.bf16.msra.mxu2 %v1124_v20 }
 0x138   : > { %v543_v22 = vmul.f32 0.5, %v542_v21  ;;  %v1123_v21 = vld [vmem:[#allocation5 + $0x30] sm:$0xff] }
 0x13a   : > { %v544_v23 = vsub.f32 1.5, %v543_v22  ;;  %v1122_v22 = vld [vmem:[#allocation5 + $0x28] sm:$0xff] }
 0x13b   : > { %v1223_v24 = vpop.eup %1222  ;;  %745 = vmatpush.bf16.msra.mxu2 %v1123_v21 }
 0x13c   : > { %v545_v25 = vmul.f32 %v1221_v18, %v544_v23  ;;  %v551_v26 = vmul.f32 %v1223_v24, %v539_v19  ;;  %vm557_vm3 = vweird.f32 %v1223_v24  ;;  %v1121_v23 = vld [vmem:[#allocation5 + $0x20] sm:$0xff] }
 0x13d   : > { %vm558_vm5 = vmor %vm556_vm4, %vm557_vm3 }
 0x13e   : > { %v552_v27 = vmul.f32 %v1223_v24, %v551_v26  ;;  %v549_v29 = vsel %vm548_vm2, %v1221_v18, %v545_v25  ;;  %v1119_v25 = vld [vmem:[#allocation5 + $0x10] sm:$0xff]  ;;  %v1118_v26 = vld [vmem:[#allocation5 + $0x8] sm:$0xff] }
 0x13f   : > { %v560_v31 = vmul.f32 %v549_v29, %v528_v6  ;;  %746 = vmatpush.bf16.msra.mxu2 %v1122_v22 }
 0x140   : > { %v553_v28 = vmul.f32 0.5, %v552_v27  ;;  %v1117_v27 = vld [vmem:[#allocation5] sm:$0xff] }
 0x141   : > { %v565_v36 = vmul.f32 %v1216_v32, %v560_v31 }
 0x142   : > { %v554_v30 = vsub.f32 1.5, %v553_v28 }
 0x143   : > { %v570_v39 = vadd.f32 %v1217_v37, %v565_v36  ;;  %747 = vmatpush.bf16.msra.mxu2 %v1121_v23 }
 0x144   : > { %v555_v33 = vmul.f32 %v1223_v24, %v554_v30 }
 0x146   : > { %v559_v34 = vsel %vm558_vm5, %v1223_v24, %v555_v33  ;;  %v1120_v24 = vld [vmem:[#allocation5 + $0x18] sm:$0xff] }
 0x147   : > { %v561_v35 = vmul.f32 %v559_v34, %v529_v11  ;;  %748 = vmatpush.bf16.msra.mxu2 %v1120_v24 }
 0x149   : > { %v566_v38 = vmul.f32 %v1216_v32, %v561_v35 }
 0x14b   : > { %v571_v40 = vadd.f32 %v1217_v37, %v566_v38  ;;  %749 = vmatpush.bf16.msra.mxu2 %v1119_v25 }
 0x14d   : > { %v572_v41 = vpack.c.bf16 %v571_v40, %v570_v39 }
 0x14f   : > { %597 = vmatpush.bf16.msra.mxu0 %v572_v41  ;;  %750 = vmatpush.bf16.msra.mxu2 %v1118_v26 }
 0x152   : > { %1037 = vmatmul.msk.bf16.vlgmr.msra.gmra.mxu0 %vm583_vm6, %v1114_v42 }
 0x153   : > { %751 = vmatpush.bf16.msra.mxu2 %v1117_v27 }
 0x162   : > { %1038 = vmatmul.msk.bf16.gmra.mxu0 %vm583_vm6, %v1115_v43 }
 0x1cf   : > { %v599_v44 = vpop.f32.mrf.mxu0 }
 0x1d0   : > { %v619_v55 = vmul.f32 %v1140_v50, %v599_v44  ;;  %v613_v63 = vmul.f32 %v1136_v49, %v599_v44 }
 0x1d7   : > { %v601_v45 = vpop.f32.mrf.mxu0 }
 0x1d8   : > { %v620_v56 = vmul.f32 %v1141_v51, %v601_v45  ;;  %v614_v59 = vmul.f32 %v1137_v52, %v601_v45 }
 0x1df   : > { %v604_v46 = vpop.f32.mrf.mxu0 }
 0x1e0   : > { %v621_v53 = vmul.f32 %v1136_v49, %v604_v46  ;;  %v615_v60 = vmul.f32 %v1140_v50, %v604_v46  ;;  %v1218_v50 = vld [vmem:[%s1687_s9] ss:$0 sm:$0xff] }
 0x1e2   : > { %v623_v61 = vadd.f32 %v621_v53, %v619_v55  ;;  %v617_v5 = vsub.f32 %v613_v63, %v615_v60 }
 0x1e7   : > { %v606_v54 = vpop.f32.mrf.mxu0 }
 0x1e8   : > { %v616_v57 = vmul.f32 %v1141_v51, %v606_v54  ;;  %v622_v58 = vmul.f32 %v1137_v52, %v606_v54  ;;  %v1132_v51 = vld [vmem:[#allocation7 + $0x38] sm:$0xff]  ;;  %v1131_v54 = vld [vmem:[#allocation7 + $0x30] sm:$0xff] }
 0x1e9   : > { %890 = vmatpush.bf16.msra.mxu3 %v1132_v51 }
 0x1ea   : > { %v624_v62 = vadd.f32 %v622_v58, %v620_v56  ;;  %v618_v2 = vsub.f32 %v614_v59, %v616_v57  ;;  %v1130_v57 = vld [vmem:[#allocation7 + $0x28] sm:$0xff] }
 0x1ec   : > { %v626_v3 = vpack.c.bf16 %v624_v62, %v623_v61  ;;  %v625_v6 = vpack.c.bf16 %v618_v2, %v617_v5  ;;  %v1129_v62 = vld [vmem:[#allocation7 + $0x20] sm:$0xff]  ;;  %v1128_v2 = vld [vmem:[#allocation7 + $0x18] sm:$0xff] }
 0x1ed   : > { %891 = vmatpush.bf16.msra.mxu3 %v1131_v54 }
 0x1ee   : > { %642 = vmatpush.bf16.msra.mxu1 %v626_v3 }
 0x1f1   : > { %892 = vmatpush.bf16.msra.mxu3 %v1130_v57 }
 0x1f2   : > { %643 = vmatpush.bf16.msra.mxu1 %v625_v6 }
 0x1f5   : > { %1043 = vmatmul.msk.bf16.vlgmr.msra.gmra.mxu1 %vm632_vm7, %v1116_v7  ;;  %893 = vmatpush.bf16.msra.mxu3 %v1129_v62  ;;  %v1127_v7 = vld [vmem:[#allocation7 + $0x10] sm:$0xff] }
 0x1f9   : > { %894 = vmatpush.bf16.msra.mxu3 %v1128_v2 }
 0x1fd   : > { %895 = vmatpush.bf16.msra.mxu3 %v1127_v7 }
 0x272   : > { %v645_v8 = vpop.f32.mrf.mxu1 }
 0x273   : > { %650 = vadd.xlane.f32.xlu2 %v645_v8 }
 0x27a   : > { %v647_v9 = vpop.f32.mrf.mxu1 }
 0x27b   : > { %652 = vadd.xlane.f32.xlu2 %v647_v9 }
 0x2e6   : > { %v651_v10 = vpop.xlane.xlu2 %650 }
 0x2e7   : > { %v654_v11 = vmul.f32 0.03125, %v651_v10 }
 0x2e9   : > { %v656_v12 = vsub.f32 %v645_v8, %v654_v11 }
 0x2eb   : > { %v658_v13 = vmul.f32 %v1590_v4, %v656_v12  ;;  %v1126_v12 = vld [vmem:[#allocation7 + $0x8] sm:$0xff] }
 0x2ec   : > { %896 = vmatpush.bf16.msra.mxu3 %v1126_v12 }
 0x2ed   : > { %v660_v14 = vmul.f32 %v658_v13, %v658_v13 }
 0x2ee   : > { %v653_v15 = vpop.xlane.xlu2 %652 }
 0x2ef   : > { %v655_v16 = vmul.f32 0.03125, %v653_v15  ;;  %662 = vadd.xlane.f32.xlu0 %v660_v14 }
 0x2f1   : > { %v657_v17 = vsub.f32 %v647_v9, %v655_v16 }
 0x2f3   : > { %v659_v18 = vmul.f32 %v1590_v4, %v657_v17  ;;  %v1125_v17 = vld [vmem:[#allocation7] sm:$0xff] }
 0x2f4   : > { %897 = vmatpush.bf16.msra.mxu3 %v1125_v17 }
 0x2f5   : > { %v661_v19 = vmul.f32 %v659_v18, %v659_v18 }
 0x2f7   : > { %664 = vadd.xlane.f32.xlu1 %v661_v19 }
 0x362   : > { %v663_v28 = vpop.xlane.xlu0 %662 }
 0x363   : > { %v666_v4 = vmul.f32 0.03125, %v663_v28 }
 0x365   : > { %v668_v29 = vadd.f32 1e-05, %v666_v4 }
 0x367   : > { %1224 = vrsqrt.f32 %v668_v29  ;;  %vm676_vm9 = vweird.f32 %v668_v29 }
 0x36a   : > { %v665_v30 = vpop.xlane.xlu1 %664 }
 0x36b   : > { %v667_v31 = vmul.f32 0.03125, %v665_v30 }
 0x36d   : > { %v1225_v32 = vpop.eup %1224  ;;  %v669_v33 = vadd.f32 1e-05, %v667_v31 }
 0x36e   : > { %v671_v34 = vmul.f32 %v1225_v32, %v668_v29  ;;  %vm677_vm8 = vweird.f32 %v1225_v32 }
 0x36f   : > { %1226 = vrsqrt.f32 %v669_v33  ;;  %vm678_vm11 = vmor %vm676_vm9, %vm677_vm8  ;;  %vm686_vm12 = vweird.f32 %v669_v33 }
 0x370   : > { %v672_v35 = vmul.f32 %v1225_v32, %v671_v34 }
 0x372   : > { %v673_v36 = vmul.f32 0.5, %v672_v35 }
 0x374   : > { %v674_v38 = vsub.f32 1.5, %v673_v36 }
 0x375   : > { %v1227_v37 = vpop.eup %1226 }
 0x376   : > { %v681_v39 = vmul.f32 %v1227_v37, %v669_v33  ;;  %v675_v42 = vmul.f32 %v1225_v32, %v674_v38  ;;  %vm687_vm10 = vweird.f32 %v1227_v37 }
 0x377   : > { %vm688_vm13 = vmor %vm686_vm12, %vm687_vm10 }
 0x378   : > { %v682_v40 = vmul.f32 %v1227_v37, %v681_v39  ;;  %v679_v44 = vsel %vm678_vm11, %v1225_v32, %v675_v42 }
 0x379   : > { %v690_v47 = vmul.f32 %v679_v44, %v658_v13 }
 0x37a   : > { %v683_v41 = vmul.f32 0.5, %v682_v40 }
 0x37c   : > { %v684_v43 = vsub.f32 1.5, %v683_v41 }
 0x37e   : > { %v685_v45 = vmul.f32 %v1227_v37, %v684_v43 }
 0x380   : > { %v689_v46 = vsel %vm688_vm13, %v1227_v37, %v685_v45 }
 0x381   : > { %v691_v48 = vmul.f32 %v689_v46, %v659_v18 }
 0x383   : > { %v692_v49 = vpack.c.bf16 %v691_v48, %v690_v47 }
 0x385   : > { %752 = vmatmul.bf16.vlgmr.msra.gmra.mxu2 %v692_v49 }
 0x408   : > { %v753_v52 = vpop.f32.mrf.mxu2 }
 0x409   : > { %v1622_v53 = vadd.f32 %v1218_v50, %v753_v52 }
 0x40b   : > { %v1625_v55 = vmul.f32 0.70710677, %v1622_v53  ;;  %v758_v7 = vmul.f32 0.5, %v1622_v53 }
 0x40d   : > { %v762_v56 = vand.u32 2147483647, %v1625_v55  ;;  %vm828_vm6 = vcmp.ge.f32.partialorder %v1625_v55, 0.0  ;;  %v1219_v55 = vld [vmem:[%s1689_s11] ss:$0 sm:$0xff] }
 0x40f   : > { %v764_v58 = vmul.f32 0.3275911, %v762_v56  ;;  %v816_v20 = vsub.f32 0.0, %v762_v56 }
 0x410   : > { %v755_v59 = vpop.f32.mrf.mxu2 }
 0x411   : > { %v766_v60 = vadd.f32 1.0, %v764_v58  ;;  %v1628_v61 = vadd.f32 %v1218_v50, %v755_v59  ;;  %v818_v27 = vmul.f32 %v816_v20, %v762_v56 }
 0x413   : > { %1228 = vrcp.f32 %v766_v60  ;;  %v1631_v63 = vmul.f32 0.70710677, %v1628_v61  ;;  %v779_v11 = vand.u32 2147483648, %v766_v60  ;;  %v777_v14 = vand.u32 2147483647, %v766_v60 }
 0x414   : > { %vm773_vm15 = vweird.f32 %v766_v60  ;;  %v820_v33 = vmul.f32 1.442695, %v818_v27 }
 0x415   : > { %v763_v3 = vand.u32 2147483647, %v1631_v63  ;;  %v780_v16 = vor.u32 1.1754944e-38, %v779_v11  ;;  %vm778_vm1 = vcmp.eq.f32.partialorder %v777_v14, 8.507059e+37  ;;  %vm829_vm7 = vcmp.ge.f32.partialorder %v1631_v63, 0.0 }
 0x417   : > { %v765_v5 = vmul.f32 0.3275911, %v763_v3  ;;  %v817_v35 = vsub.f32 0.0, %v763_v3 }
 0x419   : > { %v1229_v6 = vpop.eup %1228  ;;  %v767_v9 = vadd.f32 1.0, %v765_v5  ;;  %v819_v41 = vmul.f32 %v817_v35, %v763_v3 }
 0x41a   : > { %v769_v8 = vmul.f32 %v1229_v6, %v766_v60  ;;  %vm774_vm14 = vweird.f32 %v1229_v6 }
 0x41b   : > { %1230 = vrcp.f32 %v767_v9  ;;  %vm775_vm0 = vmor %vm773_vm15, %vm774_vm14  ;;  %v794_v25 = vand.u32 2147483648, %v767_v9  ;;  %v792_v4 = vand.u32 2147483647, %v767_v9  ;;  %vm788_vm3 = vweird.f32 %v767_v9 }
 0x41c   : > { %v770_v10 = vsub.f32 1.0, %v769_v8  ;;  %1232 = vpow2.f32 %v820_v33  ;;  %v822_v46 = vmul.f32 1.442695, %v819_v41  ;;  %v759_v8 = vmul.f32 0.5, %v1628_v61 }
 0x41d   : > { %v795_v31 = vor.u32 1.1754944e-38, %v794_v25  ;;  %vm793_vm5 = vcmp.eq.f32.partialorder %v792_v4, 8.507059e+37 }
 0x41e   : > { %v771_v13 = vmul.f32 %v1229_v6, %v770_v10  ;;  %1234 = vpow2.f32 %v822_v46 }
 0x420   : > { %v772_v15 = vadd.f32 %v1229_v6, %v771_v13 }
 0x421   : > { %v1231_v18 = vpop.eup %1230 }
 0x422   : > { %v776_v19 = vsel %vm775_vm0, %v1229_v6, %v772_v15  ;;  %v784_v21 = vmul.f32 %v1231_v18, %v767_v9  ;;  %vm789_vm2 = vweird.f32 %v1231_v18  ;;  %v1233_v48 = vpop.eup %1232 }
 0x423   : > { %v781_v22 = vsel %vm778_vm1, %v780_v16, %v776_v19  ;;  %vm790_vm4 = vmor %vm788_vm3, %vm789_vm2 }
 0x424   : > { %v798_v23 = vmul.f32 1.0614054, %v781_v22  ;;  %v785_v24 = vsub.f32 1.0, %v784_v21  ;;  %v1235_v59 = vpop.eup %1234 }
 0x426   : > { %v800_v26 = vadd.f32 -1.4531521, %v798_v23  ;;  %v786_v28 = vmul.f32 %v1231_v18, %v785_v24 }
 0x428   : > { %v802_v29 = vmul.f32 %v800_v26, %v781_v22  ;;  %v787_v30 = vadd.f32 %v1231_v18, %v786_v28 }
 0x42a   : > { %v804_v32 = vadd.f32 1.4214138, %v802_v29  ;;  %v791_v34 = vsel %vm790_vm4, %v1231_v18, %v787_v30 }
 0x42b   : > { %v796_v36 = vsel %vm793_vm5, %v795_v31, %v791_v34 }
 0x42c   : > { %v806_v37 = vmul.f32 %v804_v32, %v781_v22  ;;  %v799_v38 = vmul.f32 1.0614054, %v796_v36 }
 0x42e   : > { %v808_v39 = vadd.f32 -0.28449672, %v806_v37  ;;  %v801_v40 = vadd.f32 -1.4531521, %v799_v38 }
 0x430   : > { %v810_v42 = vmul.f32 %v808_v39, %v781_v22  ;;  %v803_v43 = vmul.f32 %v801_v40, %v796_v36 }
 0x432   : > { %v812_v44 = vadd.f32 0.2548296, %v810_v42  ;;  %v805_v45 = vadd.f32 1.4214138, %v803_v43 }
 0x434   : > { %v814_v47 = vmul.f32 %v812_v44, %v781_v22  ;;  %v807_v49 = vmul.f32 %v805_v45, %v796_v36 }
 0x436   : > { %v824_v50 = vmul.f32 %v1233_v48, %v814_v47  ;;  %v809_v51 = vadd.f32 -0.28449672, %v807_v49 }
 0x438   : > { %v811_v52 = vmul.f32 %v809_v51, %v796_v36  ;;  %v826_v54 = vsub.f32 1.0, %v824_v50 }
 0x43a   : > { %v813_v56 = vadd.f32 0.2548296, %v811_v52  ;;  %v830_v58 = vsub.f32 0.0, %v826_v54 }
 0x43c   : > { %v815_v57 = vmul.f32 %v813_v56, %v796_v36  ;;  %v832_v2 = vsel %vm828_vm6, %v826_v54, %v830_v58 }
 0x43d   : > { %v834_v5 = vadd.f32 1.0, %v832_v2 }
 0x43e   : > { %v825_v60 = vmul.f32 %v1235_v59, %v815_v57 }
 0x43f   : > { %v836_v10 = vmul.f32 %v834_v5, %v758_v7 }
 0x440   : > { %v827_v62 = vsub.f32 1.0, %v825_v60 }
 0x442   : > { %v831_v3 = vsub.f32 0.0, %v827_v62 }
 0x444   : > { %v833_v6 = vsel %vm829_vm7, %v827_v62, %v831_v3 }
 0x445   : > { %v835_v9 = vadd.f32 1.0, %v833_v6 }
 0x447   : > { %v837_v11 = vmul.f32 %v835_v9, %v759_v8 }
 0x449   : > { %v838_v12 = vpack.c.bf16 %v837_v11, %v836_v10 }
 0x44b   : > { %898 = vmatmul.bf16.vlgmr.msra.gmra.mxu3 %v838_v12 }
 0x4ce   : > { %v899_v13 = vpop.f32.mrf.mxu3 }
 0x4cf   : > { %v900_v14 = vadd.f32 %v1219_v55, %v899_v13 }
 0x4d1   : > { %v904_v63 = vadd.f32 %v900_v14, %v1581_v0 }
 0x4d3   : > { %906 = vst [vmem:[%s466_s23] sm:$0xff] %v904_v63 }
 0x4d6   : > { %v901_v53 = vpop.f32.mrf.mxu3 }
 0x4d7   : > { %v902_v61 = vadd.f32 %v1219_v55, %v901_v53 }
 0x4d9   : > { %v905_v15 = vadd.f32 %v902_v61, %v1584_v1 }
 0x4db   : > { %907 = vst [vmem:[%s466_s23 + $0x8] sm:$0xff] %v905_v15 }
 0x4dc   : > { %1353 = shalt.err (!%p1350_p10)
}
 0x4dd   : > { %s1404_s19 = smov 128   ;;  %s1405_s26 = smov 8  }
 0x4de   : > { %1152 = dma.vmem_to_hbm [thread:$0]  (%p1537_p3), %s922_s18, 256, %s924_s10, %s909_s25, %s1404_s19, %s1404_s19, %s1405_s26  }
 0x4df PF: > { %s938_s16 = sand.u32 1, %s1384_s21   ;;  %p1709_p12 = scmp.ge.s32.totalorder %s1396_s24, 2 }
 0x4e0   : > { %s939_s30 = scalar_lea.sflag [#allocation4], %s938_s16 }
 0x4e1   : > { %p1166_p13 = pnand %p1709_p12, %p1506_p6 }
 0x4e3   : > { %p1167_p0 = pneg %p1166_p13 }
 0x4e5   : > { %1379 = dma.done.wait (%p1167_p0), %s939_s30, 256  }
 0x4e6   : > { %1381 = vsyncadd (%p1167_p0), %s939_s30, 4294967040  ;;  %s1710_s24 = sld [smem:[#allocation14_spill]]  ;;  %s1713_s21 = smov %s1388_s22 }
 0x4e7   : > { %s1711_s23 = sld [smem:[#allocation12_spill]] }
 0x4e8   : > { %s1712_s14 = sld [smem:[#allocation15_spill]] }
 0x4ec   : > { %p26_p5 = scmp.ge.s32.totalorder %s1710_s24, 4  }
 0x4ed   : > { %s1714_s22 = smov %s1711_s23 }
 0x4ee   : > { %s1715_s23 = smov %s1712_s14  ;;  %28 = sbr.rel (!%p26_p5) target bundleno = 9 (0x9), region = 121 }
 0x4f3   :  { %945 = vsyncpa [#allocation3], 1 }
 0x4f4   :  { %947 = vsyncpa [#allocation3 + $0x1], 1 }
 0x4f5   :  { %948 = vsyncpa [#allocation6], 1 }
 0x4f6   :  { %949 = vsyncpa [#allocation4], 1 }
 0x4f7   :  { %951 = vsyncpa [#allocation4 + $0x1], 1 }

</bundles_post_ra>
